<compile_context>
chip_gen: v7x
topology: tpu7x:2x2x1
jax: 0.10.0
libtpu: 0.0.40
codegen_flags: <defaults>
</compile_context>

<pallas_src>
import jax
import jax.numpy as jnp
import numpy as np
from jax.experimental import pallas as pl
from jax.experimental.pallas import tpu as pltpu


# --------------------------------------------------------------------------- tiling
def _vmem_limits():
    """(vmem_limit_bytes, per-grid-step block budget) derived from the actual chip."""
    try:
        cap = int(pltpu.get_tpu_info().vmem_capacity_bytes)
    except Exception:  # interpret mode / no TPU info available
        cap = 64 * 1024 * 1024
    vmem_limit = min(int(cap * 0.75), 100 * 2**20)
    block_budget = vmem_limit // 2          # headroom for compiler scratch / spills
    return vmem_limit, block_budget


def _pick_rows(total, unit, limit):
    """Row tile: full array if it fits; else the largest divisor of `total` that is a
    multiple of `unit` and <= limit; else `limit` rounded down to `unit` (grid uses
    cdiv -- partial row blocks are safe because rows never mix in this kernel)."""
    limit = max(unit, min(limit, total))
    if total <= limit:
        return total
    t = (limit // unit) * unit
    tt = t
    while tt >= unit:
        if total % tt == 0:
            return tt
        tt -= unit
    return t


# --------------------------------------------------------------------------- kernels
def _chan_first_kernel(expand, stride, tl, mode):
    """x block (rows, expand, tl) or (rows, tl)  ->  out block:
         mode == 'matmul' / 'copy' : (rows, tl*stride)
         mode == 'store'           : (rows, tl, stride)"""
    tlo = tl * stride

    def kernel(x_ref, o_ref):
        # ---- group mean over `expand` consecutive channels (VPU adds, f32 exact scale)
        if expand > 1:
            y = x_ref[:, 0, :].astype(jnp.float32)
            for e in range(1, expand):
                y = y + x_ref[:, e, :].astype(jnp.float32)
            y = y * (1.0 / expand)
        else:
            y = x_ref[...].astype(jnp.float32)

        if stride > 1:
            if mode == "matmul":
                # tile-local 0/1 selection matrix built from iota (no HBM constant):
                # rep[l, m] = 1  iff  m // stride == l   (exact nearest-neighbour repeat)
                rows = jax.lax.broadcasted_iota(jnp.int32, (tl, tlo), 0)
                cols = jax.lax.broadcasted_iota(jnp.int32, (tl, tlo), 1)
                rep = ((cols >= rows * stride) & (cols < (rows + 1) * stride)
                       ).astype(jnp.float32)
                y = jnp.dot(y, rep, preferred_element_type=jnp.float32)
                o_ref[...] = y.astype(o_ref.dtype)
            else:  # "store": out block (rows, tl, stride) == view of (rows, tl*stride)
                yv = y.astype(o_ref.dtype)
                for s in range(stride):
                    o_ref[:, :, s] = yv
        else:
            o_ref[...] = y.astype(o_ref.dtype)

    return kernel


def _chan_last_kernel(expand, stride, C, D):
    """x block (rows, C) -> out block (rows, stride*D), lane-dense."""

    def kernel(x_ref, o_ref):
        xb = x_ref[...].astype(jnp.float32)                      # (rows, C)
        if expand > 1:
            # mm[c, d] = 1 iff d*expand <= c < (d+1)*expand  (iota-built, in-kernel)
            ci = jax.lax.broadcasted_iota(jnp.int32, (C, D), 0)
            di = jax.lax.broadcasted_iota(jnp.int32, (C, D), 1)
            mm = ((ci >= di * expand) & (ci < (di + 1) * expand)).astype(jnp.float32)
            y = jnp.dot(xb, mm, preferred_element_type=jnp.float32) * (1.0 / expand)
        else:
            y = xb
        if stride > 1:
            # out[r, s*D + d] = y[r, d]  -> (rows, stride*D) is a free view of
            # (rows, stride, D), i.e. the '(l e) d' repeat after the outer reshape.
            y = jnp.concatenate([y] * stride, axis=-1)
        o_ref[...] = y.astype(o_ref.dtype)

    return kernel


# --------------------------------------------------------------------------- wrapper
def upsample_pallas(x, stride=1, expand=1, transposed=True):
    """Pallas implementation of UpSample.forward."""
    x = jnp.asarray(x)
    assert x.ndim == 3, "expected (B, C, L) if transposed else (B, L, C)"
    assert jnp.issubdtype(x.dtype, jnp.floating), "UpSample kernel expects float inputs"
    assert stride >= 1 and expand >= 1
    if stride == 1 and expand == 1:
        return x

    itemsize = np.dtype(x.dtype).itemsize
    sub = max(8, 8 * max(1, 4 // itemsize))          # sublane unit: 8 f32 / 16 bf16
    vmem_limit, block_budget = _vmem_limits()
    data_cap = 2 * 2**20                             # ~2 MiB of input data per block

    if transposed:
        # x: (B, C, L) -> out: (B, D, L*stride)
        B, C, L = x.shape
        assert C % expand == 0
        D, Lout = C // expand, L * stride
        R = B * D

        # length tile + repeat strategy (cap MXU contraction; fallback for ragged L)
        if stride > 1:
            if L <= 256:
                tl, mode = L, "matmul"
            elif L % 128 == 0:
                tl, mode = 128, "matmul"
            else:
                tl, mode = 128, "store"
        else:
            tl, mode = (L, "copy") if L <= 1024 else (512, "copy")
        tlo = tl * stride

        # row tile from the per-generation VMEM budget (padded, double-buffered)
        if expand > 1:
            in_row = (-(-expand // sub) * sub) * tl * itemsize    # sublane-padded
        else:
            in_row = tl * itemsize
        if mode == "store":
            out_row = tl * max(stride, 128) * itemsize            # lane-padded fallback
        else:
            out_row = tlo * itemsize
        per_row = 2 * (in_row + out_row)
        rt_cap = max(sub, min(block_budget // per_row, data_cap // max(in_row, 1)))
        rt = _pick_rows(R, sub, rt_cap)
        grid = (pl.cdiv(R, rt), pl.cdiv(L, tl))

        if expand > 1:
            x2 = x.reshape(R, expand, L)              # free: channel = d*expand + e
            in_spec = pl.BlockSpec((rt, expand, tl), lambda i, j: (i, 0, j))
        else:
            x2 = x.reshape(R, L)
            in_spec = pl.BlockSpec((rt, tl), lambda i, j: (i, j))

        if mode == "store":
            out_struct = jax.ShapeDtypeStruct((R, L, stride), x.dtype)
            out_spec = pl.BlockSpec((rt, tl, stride), lambda i, j: (i, j, 0))
        else:
            out_struct = jax.ShapeDtypeStruct((R, Lout), x.dtype)
            out_spec = pl.BlockSpec((rt, tlo), lambda i, j: (i, j))

        flops = R * L * max(expand - 1, 0)
        if stride > 1 and mode == "matmul":
            flops += 2 * R * Lout * tl
        bytes_acc = (B * C * L + R * Lout) * itemsize

        out2 = pl.pallas_call(
            _chan_first_kernel(expand, stride, tl, mode),
            out_shape=out_struct,
            grid=grid,
            in_specs=[in_spec],
            out_specs=out_spec,
            compiler_params=pltpu.CompilerParams(
                dimension_semantics=("parallel", "parallel"),
                vmem_limit_bytes=vmem_limit),
            cost_estimate=pl.CostEstimate(flops=int(flops), transcendentals=0,
                                          bytes_accessed=int(bytes_acc)),
        )(x2)
        return out2.reshape(B, D, Lout)               # free row-major view

    else:
        # x: (B, L, C) -> out: (B, L*stride, D)
        B, L, C = x.shape
        assert C % expand == 0
        D, Lout = C // expand, L * stride
        R = B * L

        in_row = (-(-C // 128) * 128) * itemsize
        out_row = (-(-(stride * D) // 128) * 128) * itemsize
        per_row = 2 * (in_row + out_row)
        rt_cap = max(sub, min(block_budget // per_row, data_cap // max(in_row, 1)))
        rt = _pick_rows(R, sub, rt_cap)
        grid = (pl.cdiv(R, rt),)

        x2 = x.reshape(R, C)                          # free: row = b*L + l
        out_struct = jax.ShapeDtypeStruct((R, stride * D), x.dtype)

        flops = 2 * R * C * D if expand > 1 else 0
        bytes_acc = (R * C + R * stride * D) * itemsize

        out2 = pl.pallas_call(
            _chan_last_kernel(expand, stride, C, D),
            out_shape=out_struct,
            grid=grid,
            in_specs=[pl.BlockSpec((rt, C), lambda i: (i, 0))],
            out_specs=pl.BlockSpec((rt, stride * D), lambda i: (i, 0)),
            compiler_params=pltpu.CompilerParams(
                dimension_semantics=("parallel",),
                vmem_limit_bytes=vmem_limit),
            cost_estimate=pl.CostEstimate(flops=int(flops), transcendentals=0,
                                          bytes_accessed=int(bytes_acc)),
        )(x2)
        return out2.reshape(B, Lout, D)               # free row-major view


# --------------------------------------------------------------------------- reference
def upsample_ref(x, stride=1, expand=1, transposed=True):
    """Pure-JAX reference mirroring the einops reduce/repeat semantics."""
    if expand > 1:
        if transposed:
            B, C, L = x.shape
            x = x.reshape(B, C // expand, expand, L).mean(axis=2)
        else:
            x = x.reshape(x.shape[:-1] + (x.shape[-1] // expand, expand)).mean(axis=-1)
    if stride > 1:
        if transposed:
            x = jnp.repeat(x, stride, axis=-1)
        else:
            x = jnp.repeat(x, stride, axis=-2)
    return x


# --------------------------------------------------------------------------- demo
if __name__ == "__main__":
    key = jax.random.PRNGKey(0)
    k1, k2 = jax.random.split(key)

    # Module config: UpSample(d_input=8, stride=2, expand=2)
    d_input, stride, expand = 8, 2, 2
    B, L = 2, 16

    # transposed=True path (module default): x is (B, C, L)
    x_t = jax.random.normal(k1, (B, d_input, L), dtype=jnp.float32)
    out_t = jax.block_until_ready(
        upsample_pallas(x_t, stride=stride, expand=expand, transposed=True))
    ref_t = upsample_ref(x_t, stride=stride, expand=expand, transposed=True)
    assert out_t.shape == (B, d_input // expand, L * stride), out_t.shape
    np.testing.assert_allclose(np.asarray(out_t), np.asarray(ref_t),
                               rtol=1e-5, atol=1e-5)

    # expand-only and stride-only edge configs (transposed=True)
    out_e = jax.block_until_ready(
        upsample_pallas(x_t, stride=1, expand=expand, transposed=True))
    np.testing.assert_allclose(
        np.asarray(out_e),
        np.asarray(upsample_ref(x_t, stride=1, expand=expand, transposed=True)),
        rtol=1e-5, atol=1e-5)
    out_s = jax.block_until_ready(
        upsample_pallas(x_t, stride=stride, expand=1, transposed=True))
    np.testing.assert_allclose(
        np.asarray(out_s),
        np.asarray(upsample_ref(x_t, stride=stride, expand=1, transposed=True)),
        rtol=1e-5, atol=1e-5)

    # transposed=False path: x is (B, L, C)
    x_n = jax.random.normal(k2, (B, L, d_input), dtype=jnp.float32)
    out_n = jax.block_until_ready(
        upsample_pallas(x_n, stride=stride, expand=expand, transposed=False))
    ref_n = upsample_ref(x_n, stride=stride, expand=expand, transposed=False)
    assert out_n.shape == (B, L * stride, d_input // expand), out_n.shape
    np.testing.assert_allclose(np.asarray(out_n), np.asarray(ref_n),
                               rtol=1e-5, atol=1e-5)

    print("KERNEL_OK")
</pallas_src>

<mosaic_0001>
module attributes {stable_mosaic.version = 11 : i64} {
  func.func @kernel(%arg0: i32, %arg1: i32, %arg2: memref<8x2x16xf32, #tpu.memory_space<vmem>>, %arg3: memref<8x32xf32, #tpu.memory_space<vmem>>) attributes {dimension_semantics = [#tpu.dimension_semantics<parallel>, #tpu.dimension_semantics<parallel>], iteration_bounds = array<i64: 1, 1>, scalar_prefetch = 0 : i64, scratch_operands = 0 : i64, tpu.core_type = #tpu.core_type<tc>, window_params = [{transform_indices = @transform_0, window_bounds = array<i64: 8, 2, 16>}, {transform_indices = @transform_1, window_bounds = array<i64: 8, 32>}]} {
    %c0 = arith.constant 0 : index
    %c0_0 = arith.constant 0 : index
    %c0_1 = arith.constant 0 : index
    %0 = vector.load %arg2[%c0, %c0_0, %c0_1] : memref<8x2x16xf32, #tpu.memory_space<vmem>>, vector<8x1x16xf32>
    %1 = vector.shape_cast %0 : vector<8x1x16xf32> to vector<8x16xf32>
    %c0_2 = arith.constant 0 : index
    %c1 = arith.constant 1 : index
    %c0_3 = arith.constant 0 : index
    %2 = vector.load %arg2[%c0_2, %c1, %c0_3] : memref<8x2x16xf32, #tpu.memory_space<vmem>>, vector<8x1x16xf32>
    %3 = vector.shape_cast %2 : vector<8x1x16xf32> to vector<8x16xf32>
    %4 = arith.addf %1, %3 : vector<8x16xf32>
    %cst = arith.constant 5.000000e-01 : f32
    %5 = vector.broadcast %cst : f32 to vector<8x16xf32>
    %6 = arith.mulf %4, %5 : vector<8x16xf32>
    %7 = tpu.iota {dimensions = array<i32: 0>} : vector<16x32xi32>
    %8 = tpu.iota {dimensions = array<i32: 1>} : vector<16x32xi32>
    %c2_i32 = arith.constant 2 : i32
    %9 = vector.broadcast %c2_i32 : i32 to vector<16x32xi32>
    %10 = arith.muli %7, %9 : vector<16x32xi32>
    %11 = arith.cmpi sge, %8, %10 : vector<16x32xi32>
    %c1_i32 = arith.constant 1 : i32
    %12 = vector.broadcast %c1_i32 : i32 to vector<16x32xi32>
    %13 = arith.addi %7, %12 : vector<16x32xi32>
    %c2_i32_4 = arith.constant 2 : i32
    %14 = vector.broadcast %c2_i32_4 : i32 to vector<16x32xi32>
    %15 = arith.muli %13, %14 : vector<16x32xi32>
    %16 = arith.cmpi slt, %8, %15 : vector<16x32xi32>
    %17 = arith.andi %11, %16 : vector<16x32xi1>
    %18 = arith.extui %17 : vector<16x32xi1> to vector<16x32xi32>
    %19 = arith.sitofp %18 : vector<16x32xi32> to vector<16x32xf32>
    %cst_5 = arith.constant dense<0.000000e+00> : vector<8x32xf32>
    %20 = tpu.matmul %6, %19, %cst_5 {dimension_numbers = #tpu.dot_dimension_numbers<[1], [0], [0], [1], [0, 0, 1, 1], [], []>} : vector<8x16xf32>, vector<16x32xf32>, vector<8x32xf32> -> vector<8x32xf32>
    %c0_6 = arith.constant 0 : index
    %c0_7 = arith.constant 0 : index
    %21 = vector.load %arg3[%c0_6, %c0_7] : memref<8x32xf32, #tpu.memory_space<vmem>>, vector<8x32xf32>
    tpu.vector_store %arg3[%c0_6, %c0_7], %20 {strides = array<i32>} : memref<8x32xf32, #tpu.memory_space<vmem>>, vector<8x32xf32>,
    return
  }
  func.func @transform_0(%arg0: i32, %arg1: i32) -> (i32, i32, i32) {
    %c0_i32 = arith.constant 0 : i32
    %c0_i32_0 = arith.constant 0 : i32
    return %arg0, %c0_i32, %arg1 : i32, i32, i32
  }
  func.func @transform_1(%arg0: i32, %arg1: i32) -> (i32, i32) {
    %c0_i32 = arith.constant 0 : i32
    return %arg0, %arg1 : i32, i32
  }
}

</mosaic_0001>

<bundles_post_ra>
// kernel: tpu_custom_call.1
= control target key start
LH: loop header
LB: loop body
LE: loop exit
PB: predicated region body
PF: predicated region fallthrough
CT: control target
= control target key end

     0   :  { %6 = vsyncpa [#allocation3], 0  ;;  %s331_s0 = inlined_call_operand.hbm [shape: f32[8,2,16], index: 0, kind: input, shape index: {}]   ;;  %s332_s1 = inlined_call_operand.hbm [shape: f32[8,32], index: 1, kind: output, shape index: {}]  }
   0x1   :  { %7 = vsyncpa [#allocation4], 0  ;;  %s269_s6 = smov [#allocation2]   ;;  %s221_s10 = scalar_lea.hbm %s331_s0, 256 }
   0x2   :  { %s13_s7 = sshll.u32 %s269_s6, 4  ;;  %p222_p0 = scmp.ne.s32.totalorder %s331_s0, %s221_s10  ;;  %s14_s7 = int_to_ptr.vmem [resolvable:$true] %s13_s7 }
   0x3   :  { %p225_p1 = scmp.lt.u32.totalorder %s221_s10, %s331_s0 }
   0x5   :  { %p227_p2 = pnand %p225_p1, %p222_p0 }
   0x7   :  { %230 = shalt.err (!%p227_p2)
}
   0x8   :  { %s231_s15 = scalar_lea.vmem %s14_s7, 256  ;;  %p236_p4 = scmp.lt.s32.totalorder %s14_s7, %s14_s7 }
   0x9   :  { %p232_p3 = scmp.ne.s32.totalorder %s14_s7, %s231_s15  ;;  %p237_p5 = scmp.lt.s32.totalorder %s231_s15, %s231_s15 }
   0xb   :  { %p238_p6 = por %p237_p5, %p236_p4 }
   0xd   :  { %p239_p7 = pnand %p238_p6, %p232_p3 }
   0xf   :  { %242 = shalt.err (!%p239_p7)
}
  0x10   :  { %s270_s16 = smov 32   ;;  %s271_s17 = smov 2  }
  0x11   :  { %19 = dma.hbm_to_vmem [thread:$0]  %s331_s0, 256, %s14_s7, [#allocation3], %s270_s16, %s270_s16, %s271_s17  }
  0x12   :  { %265 = dma.done.wait [#allocation3], 256  }
  0x13   :  { %266 = vsyncadd [#allocation3], 4294967040  ;;  %v55_v0 = vlaneseq  ;;  %v272_v1 = vmov 0.0|0.0   ;;  %vm273_vm0 = vmmov 0   ;;  %v274_v4 = vmov 0.0   ;;  %s276_s0 = smov [#allocation5]  }
  0x14   :  { %210 = vmatprep.subr.bf16.mxu0 %v272_v1  ;;  %207 = vmatprep.mubr.msk.f32.mxu0 %vm273_vm0, %v274_v4  ;;  %v23_v12 = vld [vmem:[#allocation2] sm:$0x1]  ;;  %v24_v13 = vld [vmem:[#allocation2 + $0x2] sm:$0x1]  ;;  %v25_v14 = vld [vmem:[#allocation2 + $0x4] sm:$0x1] }
  0x15   :  { %v56_v2 = vshrl.u32 %v55_v0, 7  ;;  %v59_v3 = vand.u32 127, %v55_v0  ;;  %v26_v18 = vld [vmem:[#allocation2 + $0x6] sm:$0x1]  ;;  %v27_v19 = vld [vmem:[#allocation2 + $0x8] sm:$0x1] }
  0x16   :  { %v28_v20 = vld [vmem:[#allocation2 + $0xa] sm:$0x1]  ;;  %v29_v21 = vld [vmem:[#allocation2 + $0xc] sm:$0x1]  ;;  %v30_v22 = vld [vmem:[#allocation2 + $0xe] sm:$0x1] }
  0x17   :  { %v57_v5 = vadd.s32 8, %v56_v2  ;;  %v60_v6 = vmul.u32 2, %v56_v2  ;;  %v64_v7 = vadd.s32 1, %v56_v2  ;;  %v31_v23 = vld [vmem:[#allocation2 + $0x1] sm:$0x1]  ;;  %vm85_vm8 = vcmask 1041409  }
  0x18   :  { %v32_v24 = vld [vmem:[#allocation2 + $0x3] sm:$0x1]  ;;  %v33_v25 = vld [vmem:[#allocation2 + $0x5] sm:$0x1]  ;;  %v34_v26 = vld [vmem:[#allocation2 + $0x7] sm:$0x1]  ;;  %v39_v27 = vadd.f32 %v31_v23, %v23_v12 }
  0x19   :  { %v61_v8 = vmul.u32 2, %v57_v5  ;;  %vm299_vm1 = vcmp.ge.s32.totalorder %v59_v3, %v60_v6  ;;  %v65_v10 = vadd.s32 1, %v57_v5  ;;  %v66_v11 = vmul.u32 2, %v64_v7  ;;  %v35_v29 = vld [vmem:[#allocation2 + $0x9] sm:$0x1]  ;;  %s186_s20 = sshll.u32 %s276_s0, 4  ;;  %s187_s20 = int_to_ptr.vmem [resolvable:$true] %s186_s20 }
  0x1a   :  { %v40_v28 = vadd.f32 %v32_v24, %v24_v13  ;;  %v36_v30 = vld [vmem:[#allocation2 + $0xb] sm:$0x1]  ;;  %v41_v31 = vadd.f32 %v33_v25, %v25_v14  ;;  %v42_v32 = vadd.f32 %v34_v26, %v26_v18  ;;  %vm88_vm9 = vcmask 1042434   ;;  %v37_v34 = vld [vmem:[#allocation2 + $0xd] sm:$0x1]  ;;  %s243_s21 = scalar_lea.vmem %s187_s20, 128  ;;  %p248_p9 = scmp.lt.s32.totalorder %s187_s20, %s187_s20 }
  0x1b   :  { %vm303_vm2 = vcmp.ge.s32.totalorder %v59_v3, %v61_v8  ;;  %v67_v16 = vmul.u32 2, %v65_v10  ;;  %vm307_vm3 = vcmp.lt.s32.totalorder %v59_v3, %v66_v11  ;;  %v275_v33 = vmov 1.0|1.0   ;;  %v38_v35 = vld [vmem:[#allocation2 + $0xf] sm:$0x1]  ;;  %p244_p8 = scmp.ne.s32.totalorder %s187_s20, %s243_s21  ;;  %p249_p10 = scmp.lt.s32.totalorder %s243_s21, %s243_s21 }
  0x1c   :  { %vm70_vm4 = vmand %vm299_vm1, %vm307_vm3  ;;  %v43_v36 = vadd.f32 %v35_v29, %v27_v19  ;;  %v44_v37 = vadd.f32 %v36_v30, %v28_v20  ;;  %v47_v38 = vmul.f32 0.5, %v39_v27  ;;  %v48_v39 = vmul.f32 0.5, %v40_v28 }
  0x1d   :  { %vm69_vm5 = vcmp.lt.s32.totalorder %v59_v3, %v67_v16  ;;  %v45_v40 = vadd.f32 %v37_v34, %v29_v21  ;;  %v46_v41 = vadd.f32 %v38_v35, %v30_v22  ;;  %v49_v42 = vmul.f32 0.5, %v41_v31  ;;  %p250_p11 = por %p249_p10, %p248_p9 }
  0x1e   :  { %vm71_vm6 = vmand %vm303_vm2, %vm69_vm5  ;;  %v50_v43 = vmul.f32 0.5, %v42_v32  ;;  %v51_v44 = vmul.f32 0.5, %v43_v36  ;;  %v52_v45 = vmul.f32 0.5, %v44_v37  ;;  %v84_v46 = vrot.slane %v48_v39, 7 }
  0x1f   :  { %vm211_vm7 = vmpackc.low %vm71_vm6, %vm70_vm4  ;;  %vm91_vm10 = vcmask 1043459   ;;  %v53_v47 = vmul.f32 0.5, %v45_v40  ;;  %v54_v48 = vmul.f32 0.5, %v46_v41  ;;  %v87_v49 = vrot.slane %v49_v42, 6  ;;  %p251_p12 = pnand %p250_p11, %p244_p8 }
  0x20   :  { %212 = vmatpush3.bf16.msk.msra.mxu0 %vm211_vm7, %v275_v33  ;;  %v90_v50 = vrot.slane %v50_v43, 5  ;;  %v86_v51 = vsel %vm85_vm8, %v84_v46, %v47_v38  ;;  %v93_v52 = vrot.slane %v51_v44, 4  ;;  %vm94_vm11 = vcmask 1044484  }
  0x21   :  { %v96_v53 = vrot.slane %v52_v45, 3  ;;  %v89_v54 = vsel %vm88_vm9, %v87_v49, %v86_v51  ;;  %vm97_vm12 = vcmask 1045509   ;;  %v99_v55 = vrot.slane %v53_v47, 2 }
  0x22   :  { %v92_v56 = vsel %vm91_vm10, %v90_v50, %v89_v54  ;;  %vm100_vm13 = vcmask 1046534   ;;  %v102_v57 = vrot.slane %v54_v48, 1  ;;  %vm103_vm14 = vcmask 1047559  }
  0x23   :  { %v95_v58 = vsel %vm94_vm11, %v93_v52, %v92_v56  ;;  %vm105_vm15 = vcmask 130048   ;;  %vm178_vm0 = vcmask 261120  }
  0x24   :  { %v98_v59 = vsel %vm97_vm12, %v96_v53, %v95_v58 }
  0x25   :  { %v101_v60 = vsel %vm100_vm13, %v99_v55, %v98_v59 }
  0x26   :  { %v104_v61 = vsel %vm103_vm14, %v102_v57, %v101_v60 }
  0x27   :  { %208 = vmatmul.mubr.msk.f32.vlgmr.msra.gmra.mrb[0].mxu0 %vm105_vm15, %v104_v61 }
  0xfa   :  { %v174_v62 = vpop.f32.mrb[0].mxu0 }
  0xfb   :  { %v209_v63 = vpop.f32.mrb[1].mxu0  ;;  %179 = vst.msk [vmem:[#allocation5] sm:$0xff] %vm178_vm0, %v174_v62 }
  0xfc   :  { %254 = shalt.err (!%p251_p12)
}
  0xfd   :  { %s255_s24 = scalar_lea.hbm %s332_s1, 128 }
  0xfe   :  { %p256_p13 = scmp.ne.s32.totalorder %s332_s1, %s255_s24  ;;  %p259_p0 = scmp.lt.u32.totalorder %s255_s24, %s332_s1 }
 0x100   :  { %p261_p1 = pnand %p259_p0, %p256_p13 }
 0x102   :  { %264 = shalt.err (!%p261_p1)
}
 0x103   :  { %189 = dma.vmem_to_hbm [thread:$0]  %s187_s20, 128, %s332_s1, [#allocation4]  }
 0x104   :  { %267 = dma.done.wait [#allocation4], 128  }
 0x105   :  { %268 = vsyncadd [#allocation4], 4294967168 }
 0x106   :  { %193 = vsyncpa [#allocation3], 1 }
 0x107   :  { %194 = vsyncpa [#allocation4], 1 }

</bundles_post_ra>
